<compile_context>
chip_gen: v7x
topology: tpu7x:2x2x1
jax: 0.10.0
libtpu: 0.0.40
codegen_flags: <defaults>
</compile_context>

<pallas_src>
import jax
import jax.numpy as jnp
from jax import lax
from jax.experimental import pallas as pl
from jax.experimental.pallas import tpu as pltpu


def soft_ce_kernel(cls_ref, y_ref, idx_ref, out_ref):
    x = cls_ref[...].astype(jnp.float32)             # (TILE_N, C) logits
    y = y_ref[...].astype(jnp.float32)               # (TILE_N, 1) gathered soft label
    idx = idx_ref[...]                                # (TILE_N, 1) int32 class index

    # Numerically stable softmax pieces; the full (TILE_N, C) softmax is never built.
    m = jnp.max(x, axis=1, keepdims=True)
    e = jnp.exp(x - m)                                # (TILE_N, C)
    sum_e = jnp.sum(e, axis=1, keepdims=True)         # (TILE_N, 1)

    # Pick column label_[i] per row via one-hot mask (no dynamic gather on TPU).
    col = lax.broadcasted_iota(jnp.int32, x.shape, 1)
    onehot = (col == idx).astype(jnp.float32)         # idx < 0 -> all-zero row
    e_pick = jnp.sum(e * onehot, axis=1, keepdims=True)

    # Only a per-row reciprocal (exact) instead of an (N, C) full-matrix divide.
    p = e_pick * pl.reciprocal(sum_e, approx=False)   # sm[i, label_[i]]

    # Invalid / padded rows: p == 0 and y == 0 -> term is exactly 0 (no mask needed).
    out_ref[...] = (jnp.abs(y - p) * (-1.0) * jnp.log(p + 1e-6)).astype(out_ref.dtype)


def soft_cross_entropy_loss(cls_score, label, label_, avg_factor, tile_n=None):
    """cls_score: (N, C); label: (N, C) soft labels; label_: (N,) int class ids
    (negative => ignored row); avg_factor: scalar divisor."""
    N, C = cls_score.shape

    idx = label_.astype(jnp.int32)
    valid = idx >= 0
    safe_idx = jnp.where(valid, idx, 0)

    # Gather the single soft-label element used per row OUTSIDE the kernel so the
    # full (N, C) label matrix never has to be DMA'd through the kernel.
    y_pick = jnp.take_along_axis(label, safe_idx[:, None], axis=1)
    y_pick = jnp.where(valid[:, None], y_pick, jnp.zeros_like(y_pick))
    idx2d = idx[:, None]

    # Row tile: multiple of 8, ~2 MiB of f32 logits per buffer (double-buffered it
    # stays far below the scoped VMEM limit on v5e/v6e/v7x), capped at 512 rows,
    # and never larger than needed for this N.
    if tile_n is None:
        cap = max(8, min(512, (2 * 1024 * 1024) // max(4 * C, 1)))
        cap = max(8, (cap // 8) * 8)
        tile_n = min(cap, ((N + 7) // 8) * 8)
    tile_n = max(8, ((tile_n + 7) // 8) * 8)

    num_blocks = pl.cdiv(N, tile_n)
    n_pad = num_blocks * tile_n
    pad = n_pad - N
    if pad:
        cls_score = jnp.pad(cls_score, ((0, pad), (0, 0)))
        y_pick = jnp.pad(y_pick, ((0, pad), (0, 0)))
        idx2d = jnp.pad(idx2d, ((0, pad), (0, 0)), constant_values=-1)

    per_row = pl.pallas_call(
        soft_ce_kernel,
        out_shape=jax.ShapeDtypeStruct((n_pad, 1), jnp.float32),
        grid_spec=pltpu.PrefetchScalarGridSpec(
            num_scalar_prefetch=0,
            grid=(num_blocks,),
            in_specs=[
                pl.BlockSpec((tile_n, C), lambda i: (i, 0)),   # logits tile
                pl.BlockSpec((tile_n, 1), lambda i: (i, 0)),   # gathered soft label
                pl.BlockSpec((tile_n, 1), lambda i: (i, 0)),   # class index
            ],
            out_specs=pl.BlockSpec((tile_n, 1), lambda i: (i, 0)),
        ),
        compiler_params=pltpu.CompilerParams(
            dimension_semantics=("parallel",),
            vmem_limit_bytes=32 * 1024 * 1024,
        ),
    )(cls_score, y_pick, idx2d)

    # Tiny final reduction + normalization in the wrapper (padded rows are 0).
    return jnp.sum(per_row) / jnp.asarray(avg_factor, jnp.float32)


if __name__ == "__main__":
    key = jax.random.PRNGKey(0)
    N, C = 40, 32
    k1, k2, k3 = jax.random.split(key, 3)
    cls_score = jax.random.normal(k1, (N, C), dtype=jnp.float32)
    label = jax.random.uniform(k2, (N, C), dtype=jnp.float32)   # soft labels
    label_ = jax.random.randint(k3, (N,), -1, C, dtype=jnp.int32)
    label_ = label_.at[0].set(5).at[1].set(-1)                  # ensure both cases present
    avg_factor = jnp.sum(label_ >= 0).astype(jnp.float32)

    # tile_n=16 forces a multi-step grid (plus row padding) even at this small N.
    loss = soft_cross_entropy_loss(cls_score, label, label_, avg_factor, tile_n=16)
    loss = jax.block_until_ready(loss)

    # pure-JAX reference for correctness
    sm = jax.nn.softmax(cls_score, axis=1)
    valid = label_ >= 0
    safe_idx = jnp.where(valid, label_, 0)
    rows = jnp.arange(N)
    p_ref = sm[rows, safe_idx]
    y_ref = label[rows, safe_idx]
    ref = jnp.sum(
        jnp.where(valid, jnp.abs(y_ref - p_ref) * -1.0 * jnp.log(p_ref + 1e-6), 0.0)
    ) / avg_factor

    assert jnp.allclose(loss, ref, rtol=1e-5, atol=1e-5), (loss, ref)
    print("KERNEL_OK")
</pallas_src>

<mosaic_0001>
module attributes {stable_mosaic.version = 11 : i64} {
  func.func @soft_ce_kernel(%arg0: i32, %arg1: memref<16x32xf32, #tpu.memory_space<vmem>>, %arg2: memref<16x1xf32, #tpu.memory_space<vmem>>, %arg3: memref<16x1xi32, #tpu.memory_space<vmem>>, %arg4: memref<16x1xf32, #tpu.memory_space<vmem>>) attributes {dimension_semantics = [#tpu.dimension_semantics<parallel>], iteration_bounds = array<i64: 3>, scalar_prefetch = 0 : i64, scratch_operands = 0 : i64, tpu.core_type = #tpu.core_type<tc>, window_params = [{transform_indices = @transform_0, window_bounds = array<i64: 16, 32>}, {transform_indices = @transform_1, window_bounds = array<i64: 16, 1>}, {transform_indices = @transform_2, window_bounds = array<i64: 16, 1>}, {transform_indices = @transform_3, window_bounds = array<i64: 16, 1>}]} {
    %c0 = arith.constant 0 : index
    %c0_0 = arith.constant 0 : index
    %0 = vector.load %arg1[%c0, %c0_0] : memref<16x32xf32, #tpu.memory_space<vmem>>, vector<16x32xf32>
    %c0_1 = arith.constant 0 : index
    %c0_2 = arith.constant 0 : index
    %1 = vector.load %arg2[%c0_1, %c0_2] : memref<16x1xf32, #tpu.memory_space<vmem>>, vector<16x1xf32>
    %c0_3 = arith.constant 0 : index
    %c0_4 = arith.constant 0 : index
    %2 = vector.load %arg3[%c0_3, %c0_4] : memref<16x1xi32, #tpu.memory_space<vmem>>, vector<16x1xi32>
    %cst = arith.constant dense<0xFF800000> : vector<16xf32>
    %3 = vector.multi_reduction <maximumf>, %0, %cst [1] : vector<16x32xf32> to vector<16xf32>
    %4 = vector.shape_cast %3 : vector<16xf32> to vector<16x1xf32>
    %5 = vector.broadcast %4 : vector<16x1xf32> to vector<16x32xf32>
    %6 = arith.subf %0, %5 : vector<16x32xf32>
    %7 = math.exp %6 : vector<16x32xf32>
    %cst_5 = arith.constant dense<0.000000e+00> : vector<16xf32>
    %8 = vector.multi_reduction <add>, %7, %cst_5 [1] : vector<16x32xf32> to vector<16xf32>
    %9 = vector.shape_cast %8 : vector<16xf32> to vector<16x1xf32>
    %10 = tpu.iota {dimensions = array<i32: 1>} : vector<16x32xi32>
    %11 = vector.broadcast %2 : vector<16x1xi32> to vector<16x32xi32>
    %12 = arith.cmpi eq, %10, %11 : vector<16x32xi32>
    %13 = arith.extui %12 : vector<16x32xi1> to vector<16x32xi32>
    %14 = arith.sitofp %13 : vector<16x32xi32> to vector<16x32xf32>
    %15 = arith.mulf %7, %14 : vector<16x32xf32>
    %cst_6 = arith.constant dense<0.000000e+00> : vector<16xf32>
    %16 = vector.multi_reduction <add>, %15, %cst_6 [1] : vector<16x32xf32> to vector<16xf32>
    %17 = vector.shape_cast %16 : vector<16xf32> to vector<16x1xf32>
    %18 = tpu.reciprocal %9 : vector<16x1xf32> -> vector<16x1xf32>
    %19 = arith.mulf %17, %18 : vector<16x1xf32>
    %20 = arith.subf %1, %19 : vector<16x1xf32>
    %21 = math.absf %20 : vector<16x1xf32>
    %cst_7 = arith.constant -1.000000e+00 : f32
    %22 = vector.broadcast %cst_7 : f32 to vector<16x1xf32>
    %23 = arith.mulf %21, %22 : vector<16x1xf32>
    %cst_8 = arith.constant 9.99999997E-7 : f32
    %24 = vector.broadcast %cst_8 : f32 to vector<16x1xf32>
    %25 = arith.addf %19, %24 : vector<16x1xf32>
    %26 = math.log %25 : vector<16x1xf32>
    %27 = arith.mulf %23, %26 : vector<16x1xf32>
    %c0_9 = arith.constant 0 : index
    %c0_10 = arith.constant 0 : index
    %28 = vector.load %arg4[%c0_9, %c0_10] : memref<16x1xf32, #tpu.memory_space<vmem>>, vector<16x1xf32>
    tpu.vector_store %arg4[%c0_9, %c0_10], %27 {strides = array<i32>} : memref<16x1xf32, #tpu.memory_space<vmem>>, vector<16x1xf32>,
    return
  }
  func.func @transform_0(%arg0: i32) -> (i32, i32) {
    %c0_i32 = arith.constant 0 : i32
    %c0_i32_0 = arith.constant 0 : i32
    return %arg0, %c0_i32 : i32, i32
  }
  func.func @transform_1(%arg0: i32) -> (i32, i32) {
    %c0_i32 = arith.constant 0 : i32
    %c0_i32_0 = arith.constant 0 : i32
    return %arg0, %c0_i32 : i32, i32
  }
  func.func @transform_2(%arg0: i32) -> (i32, i32) {
    %c0_i32 = arith.constant 0 : i32
    %c0_i32_0 = arith.constant 0 : i32
    return %arg0, %c0_i32 : i32, i32
  }
  func.func @transform_3(%arg0: i32) -> (i32, i32) {
    %c0_i32 = arith.constant 0 : i32
    %c0_i32_0 = arith.constant 0 : i32
    return %arg0, %c0_i32 : i32, i32
  }
}

</mosaic_0001>

<bundles_post_ra>
// kernel: tpu_custom_call.1
= control target key start
LH: loop header
LB: loop body
LE: loop exit
PB: predicated region body
PF: predicated region fallthrough
CT: control target
= control target key end

     0   :  { %s437_s12 = smov 0   ;;  %s472_s0 = inlined_call_operand.vmem [shape: f32[48,32], index: 0, kind: input, shape index: {}]   ;;  %s473_s1 = inlined_call_operand.vmem [shape: f32[48,1], index: 1, kind: input, shape index: {}]   ;;  %s474_s2 = inlined_call_operand.vmem [shape: s32[48,1], index: 2, kind: input, shape index: {}]   ;;  %s475_s3 = inlined_call_operand.vmem [shape: f32[48,1], index: 3, kind: output, shape index: {}]  }
   0x1 LB: > { %s366_s13 = sadd.s32 4294967295, %s413_s12   ;;  %p370_p0 = scmp.ge.s32.totalorder %s413_s12, 1  ;;  %s413_s12 = sphi %s437_s12, %s13_s12  }
   0x2   : > { %p160_p1 = scmp.lt.s32.totalorder %s413_s12, 4 }
   0x4   : > { %p161_p2 = pnand %p370_p0, %p160_p1 }
   0x5   : > { %s371_s14 = sshll.u32 (!%p161_p2), %s366_s13, 1  ;;  %v415_v0 = vmov (!%p161_p2), 0   ;;  %vm224_vm0 = vcmask (!%p161_p2), 261120   ;;  %v243_v9 = vlaneseq (!%p161_p2)  ;;  %v416_v17 = vmov (!%p161_p2), 0.0  }
   0x6   : > { %164 = sbr.rel (%p161_p2) target bundleno = 353 (0x161), region = 32  ;;  %p195_p3 = scmp.lt.s32.totalorder (!%p161_p2), %s371_s14, 5  ;;  %393 = vset.pattern.permute.xlu1 (!%p161_p2), %v415_v0  ;;  %394 = vset.pattern.permute.xlu0 (!%p161_p2), %v415_v0  ;;  %vm283_vm3 = vcmask (!%p161_p2), 7168  }
   0x7   : > { %v244_v14 = vand.u32 (!%p161_p2), 127, %v243_v9 }
   0xd   : > { %s477_s14 = smov (!%p195_p3, %s371_s14), 5 }
   0xe   : > { %s445_s15 = sshll.u32 %s477_s14, 3 }
   0xf   : > { %s198_s18 = scalar_lea.vmem %s472_s0, %s445_s15  ;;  %s210_s21 = scalar_lea.vmem %s474_s2, %s445_s15 }
  0x10   : > { %v218_v1 = vld [vmem:[%s198_s18] sm:$0xff]  ;;  %v219_v2 = vld [vmem:[%s198_s18 + $0x8] sm:$0xff]  ;;  %s204_s24 = scalar_lea.vmem %s473_s1, %s445_s15  ;;  %s216_s27 = scalar_lea.vmem %s475_s3, %s445_s15 }
  0x11   : > { %v225_v3 = vsel %vm224_vm0, %v218_v1, -inf  ;;  %v222_v4 = vld [vmem:[%s210_s21] sm:$0xff]  ;;  %v228_v5 = vsel %vm224_vm0, %v219_v2, -inf  ;;  %v223_v6 = vld [vmem:[%s210_s21 + $0x8] sm:$0xff] }
  0x12   : > { %226 = vmax.xlane.f32.xlu0 %v225_v3  ;;  %246 = vperm.xlu1 %393, %v222_v4   ;;  %v220_v36 = vld [vmem:[%s204_s24] sm:$0xff]  ;;  %v221_v40 = vld [vmem:[%s204_s24 + $0x8] sm:$0xff] }
  0x16   : > { %229 = vmax.xlane.f32.xlu0 %v228_v5  ;;  %249 = vperm.xlu1 %393, %v223_v6  }
  0x91   : > { %v247_v13 = vpop.permute.xlu1 %246 }
  0x92   : > { %vm251_vm1 = vcmp.eq.s32.totalorder %v244_v14, %v247_v13 }
  0x93   : > { %v379_v18 = vsel %vm251_vm1, 1.0, %v416_v17 }
  0x95   : > { %v250_v16 = vpop.permute.xlu1 %249 }
  0x96   : > { %vm252_vm2 = vcmp.eq.s32.totalorder %v244_v14, %v250_v16 }
  0x97   : > { %v380_v22 = vsel %vm252_vm2, 1.0, %v416_v17 }
  0x9f   : > { %v227_v7 = vpop.xlane.xlu0 %226 }
  0xa0   : > { %v231_v8 = vsub.f32 %v218_v1, %v227_v7 }
  0xa2   : > { %v233_v10 = vmul.f32 1.442695, %v231_v8 }
  0xa3   : > { %v230_v11 = vpop.xlane.xlu0 %229 }
  0xa4   : > { %395 = vpow2.f32 %v233_v10  ;;  %v232_v12 = vsub.f32 %v219_v2, %v230_v11 }
  0xa6   : > { %v235_v15 = vmul.f32 1.442695, %v232_v12 }
  0xa8   : > { %397 = vpow2.f32 %v235_v15 }
  0xae   : > { %v396_v19 = vpop.eup %395 }
  0xaf   : > { %v237_v20 = vsel %vm224_vm0, %v396_v19, 0.0  ;;  %v257_v21 = vmul.f32 %v396_v19, %v379_v18 }
  0xb0   : > { %238 = vadd.xlane.f32.xlu0 %v237_v20 }
  0xb1   : > { %v259_v24 = vsel %vm224_vm0, %v257_v21, 0.0 }
  0xb2   : > { %v398_v23 = vpop.eup %397 }
  0xb3   : > { %v240_v25 = vsel %vm224_vm0, %v398_v23, 0.0  ;;  %v258_v26 = vmul.f32 %v398_v23, %v380_v22 }
  0xb4   : > { %260 = vadd.xlane.f32.xlu0 %v259_v24  ;;  %241 = vadd.xlane.f32.xlu1 %v240_v25 }
  0xb5   : > { %v262_v27 = vsel %vm224_vm0, %v258_v26, 0.0 }
  0xb8   : > { %263 = vadd.xlane.f32.xlu0 %v262_v27 }
 0x13d   : > { %v239_v28 = vpop.xlane.xlu0 %238 }
 0x13e   : > { %399 = vrcp.f32 %v239_v28 }
 0x141   : > { %v242_v29 = vpop.xlane.xlu1 %241  ;;  %v261_v30 = vpop.xlane.xlu0 %260 }
 0x142   : > { %401 = vrcp.f32 %v242_v29 }
 0x145   : > { %v264_v35 = vpop.xlane.xlu0 %263 }
 0x148   : > { %v400_v31 = vpop.eup %399 }
 0x149   : > { %v267_v32 = vmul.f32 %v400_v31, %v261_v30 }
 0x14b   : > { %v275_v33 = vadd.f32 1e-06, %v267_v32  ;;  %v269_v39 = vsub.f32 %v220_v36, %v267_v32 }
 0x14c   : > { %v402_v34 = vpop.eup %401 }
 0x14d   : > { %403 = vlog2.f32 %v275_v33  ;;  %v268_v37 = vmul.f32 %v402_v34, %v264_v35  ;;  %v271_v41 = vand.u32 2147483647, %v269_v39 }
 0x14f   : > { %v276_v38 = vadd.f32 1e-06, %v268_v37  ;;  %v270_v42 = vsub.f32 %v221_v40, %v268_v37  ;;  %v273_v44 = vmul.f32 -1.0, %v271_v41 }
 0x151   : > { %405 = vlog2.f32 %v276_v38  ;;  %v272_v46 = vand.u32 2147483647, %v270_v42 }
 0x153   : > { %v274_v49 = vmul.f32 -1.0, %v272_v46 }
 0x157   : > { %v404_v43 = vpop.eup %403 }
 0x158   : > { %v278_v45 = vmul.f32 0.6931472, %v404_v43 }
 0x15a   : > { %v281_v47 = vmul.f32 %v278_v45, %v273_v44 }
 0x15b   : > { %v406_v48 = vpop.eup %405 }
 0x15c   : > { %284 = vst.msk [vmem:[%s216_s27] sm:$0xff] %vm283_vm3, %v281_v47  ;;  %v280_v50 = vmul.f32 0.6931472, %v406_v48 }
 0x15e   : > { %v282_v51 = vmul.f32 %v280_v50, %v274_v49 }
 0x160   : > { %285 = vst.msk [vmem:[%s216_s27 + $0x8] sm:$0xff] %vm283_vm3, %v282_v51 }
 0x161 PF: > { %s13_s12 = sadd.s32 1, %s413_s12  }
 0x162   : > { %p10_p4 = scmp.ge.s32.totalorder %s13_s12, 5  }
 0x164   :  { %12 = sbr.rel (!%p10_p4) target bundleno = 1 (0x1), region = 68 }

</bundles_post_ra>
